<compile_context>
chip_gen: v7x
topology: tpu7x:2x2x1
jax: 0.10.0
libtpu: 0.0.40
codegen_flags: <defaults>
</compile_context>

<pallas_src>
import functools
import math

import jax
import jax.numpy as jnp
from jax.experimental import pallas as pl
from jax.experimental.pallas import tpu as pltpu


# ----------------------------------------------------------------------------
# helpers / hardware-aware budgets
# ----------------------------------------------------------------------------
_SQRT_2_OVER_PI = 0.7978845608028654
_LN_EPS = 1e-5  # nn.LayerNorm default


def _gelu(x):
    # TODO(synk): tanh-approx GELU; PyTorch nn.GELU() default is the exact erf
    # form (difference ~1e-3 abs). Same formula is used by the reference below.
    return 0.5 * x * (1.0 + jnp.tanh(_SQRT_2_OVER_PI * (x + 0.044715 * x * x * x)))


def _round_up(x, m):
    return ((x + m - 1) // m) * m


def _phys_vmem_bytes():
    try:
        return int(pltpu.get_tpu_info().vmem_capacity_bytes)
    except Exception:
        return 64 << 20  # conservative: v7x per-TensorCore VMEM


_PHYS_VMEM_BYTES = _phys_vmem_bytes()
# scoped limit ~60% of physical; 38 MiB on v7x, ~77 MiB on v5e/v6e
_VMEM_LIMIT = max(32 << 20, min(int(_PHYS_VMEM_BYTES * 0.6), 96 << 20))
# smaller row tiles on the 64 MiB-VMEM generation
_TILE_M_MAX = 256 if _PHYS_VMEM_BYTES <= (64 << 20) else 512
# column tiling kicks in only for very wide layers; multiple of 256 (v6e MXU)
_TILE_N_MAX = 1024


# ----------------------------------------------------------------------------
# fused linear (optional LayerNorm in, GELU, residual add) Pallas kernel
# ----------------------------------------------------------------------------
def _make_linear_kernel(activation, has_ln, has_res, eps):
    def kernel(*refs):
        it = iter(refs)
        x_ref = next(it)          # (TILE_M, K) bf16
        w_ref = next(it)          # (K, TILE_N) bf16
        b_ref = next(it)          # (1, TILE_N) f32
        g_ref = bt_ref = r_ref = None
        if has_ln:
            g_ref = next(it)      # (1, K) f32
            bt_ref = next(it)     # (1, K) f32
        if has_res:
            r_ref = next(it)      # (TILE_M, TILE_N) bf16
        o_ref = next(it)          # (TILE_M, TILE_N) bf16

        x = x_ref[...]
        if has_ln:
            xf = x.astype(jnp.float32)
            mean = jnp.mean(xf, axis=-1, keepdims=True)
            xc = xf - mean
            var = jnp.mean(xc * xc, axis=-1, keepdims=True)
            xn = xc * jax.lax.rsqrt(var + eps)
            xn = xn * g_ref[...].astype(jnp.float32) + bt_ref[...].astype(jnp.float32)
            x = xn.astype(jnp.bfloat16)

        acc = jnp.dot(x, w_ref[...], preferred_element_type=jnp.float32)
        acc = acc + b_ref[...].astype(jnp.float32)
        if activation == "gelu":
            acc = _gelu(acc)
        if has_res:
            acc = acc + r_ref[...].astype(jnp.float32)
        o_ref[...] = acc.astype(o_ref.dtype)

    return kernel


def pallas_linear(x, w, b, activation=None, residual=None, ln=None):
    """y = [LN(x)] @ w + b [; GELU] [; + residual], bf16 operands, f32 accum."""
    orig_shape = x.shape
    K = orig_shape[-1]
    E = w.shape[1]

    x2 = x.reshape(-1, K).astype(jnp.bfloat16)
    w2 = w.astype(jnp.bfloat16)
    b2 = b.reshape(1, E).astype(jnp.float32)
    M = x2.shape[0]

    tile_m = min(_TILE_M_MAX, _round_up(M, 8))
    grid_m = pl.cdiv(M, tile_m)
    tile_n = E if E <= _TILE_N_MAX else _TILE_N_MAX   # E or a multiple of 128
    grid_n = pl.cdiv(E, tile_n)
    resident = grid_n == 1   # weight fully resident -> single-buffer it

    def _spec(shape, imap, single_buffer=False):
        if single_buffer:
            return pl.BlockSpec(shape, imap, pipeline_mode=pl.Buffered(1))
        return pl.BlockSpec(shape, imap)

    in_specs = [
        pl.BlockSpec((tile_m, K), lambda i, j: (i, 0)),              # row tile
        _spec((K, tile_n), lambda i, j: (0, j), single_buffer=resident),  # weight
        _spec((1, tile_n), lambda i, j: (0, j), single_buffer=resident),  # bias
    ]
    operands = [x2, w2, b2]

    has_ln = ln is not None
    if has_ln:
        g, bt = ln
        in_specs += [
            _spec((1, K), lambda i, j: (0, 0), single_buffer=True),
            _spec((1, K), lambda i, j: (0, 0), single_buffer=True),
        ]
        operands += [g.reshape(1, K).astype(jnp.float32),
                     bt.reshape(1, K).astype(jnp.float32)]

    has_res = residual is not None
    if has_res:
        in_specs.append(pl.BlockSpec((tile_m, tile_n), lambda i, j: (i, j)))
        operands.append(residual.reshape(-1, E).astype(jnp.bfloat16))

    flops = 2 * M * K * E
    transcendentals = M * E if activation == "gelu" else 0
    bytes_accessed = 2 * (M * K + K * E + M * E) + 4 * E
    if has_res:
        bytes_accessed += 2 * M * E
    if has_ln:
        bytes_accessed += 8 * K

    out = pl.pallas_call(
        _make_linear_kernel(activation, has_ln, has_res, _LN_EPS),
        out_shape=jax.ShapeDtypeStruct((M, E), jnp.bfloat16),
        grid_spec=pltpu.PrefetchScalarGridSpec(
            num_scalar_prefetch=0,
            grid=(grid_m, grid_n),
            in_specs=in_specs,
            out_specs=pl.BlockSpec((tile_m, tile_n), lambda i, j: (i, j)),
        ),
        compiler_params=pltpu.CompilerParams(
            dimension_semantics=("parallel", "parallel"),
            vmem_limit_bytes=_VMEM_LIMIT,
        ),
        cost_estimate=pl.CostEstimate(
            flops=flops,
            transcendentals=transcendentals,
            bytes_accessed=bytes_accessed,
        ),
    )(*operands)

    return out.reshape(*orig_shape[:-1], E)


# ----------------------------------------------------------------------------
# attention Pallas kernel (heads split in-register, lane-dense output)
# ----------------------------------------------------------------------------
def _attention_kernel(qkv_ref, o_ref, *, num_heads, scale):
    # qkv_ref: (1, N, 3C) bf16; o_ref: (1, N, C) bf16.
    C = o_ref.shape[-1]
    hd = C // num_heads
    qkv = qkv_ref[0]
    heads = []
    for h in range(num_heads):
        q = qkv[:, h * hd:(h + 1) * hd]
        k = qkv[:, C + h * hd:C + (h + 1) * hd]
        v = qkv[:, 2 * C + h * hd:2 * C + (h + 1) * hd]
        s = jax.lax.dot_general(
            q, k, (((1,), (1,)), ((), ())), preferred_element_type=jnp.float32
        ) * scale
        s = s - jnp.max(s, axis=-1, keepdims=True)
        p = jnp.exp(s)
        denom = jnp.sum(p, axis=-1, keepdims=True)
        o = jnp.dot(p.astype(qkv.dtype), v, preferred_element_type=jnp.float32)
        # deferred softmax normalization: EUP reciprocal + N*hd multiplies
        # instead of N*N VPU divides.
        o = o * pl.reciprocal(denom, approx=True)
        heads.append(o)
    o_ref[0] = jnp.concatenate(heads, axis=-1).astype(o_ref.dtype)


def pallas_attention(qkv, num_heads, scale):
    # TODO(synk): monolithic NxN score matrix per batch row; switch to a
    # flash-style online-softmax kv loop for N >= ~512 (v7x 64 MiB VMEM).
    Bx, N, C3 = qkv.shape
    C = C3 // 3
    qkv = qkv.astype(jnp.bfloat16)
    return pl.pallas_call(
        functools.partial(_attention_kernel, num_heads=num_heads, scale=scale),
        out_shape=jax.ShapeDtypeStruct((Bx, N, C), jnp.bfloat16),
        grid_spec=pltpu.PrefetchScalarGridSpec(
            num_scalar_prefetch=0,
            grid=(Bx,),
            in_specs=[pl.BlockSpec((1, N, C3), lambda i: (i, 0, 0))],
            out_specs=pl.BlockSpec((1, N, C), lambda i: (i, 0, 0)),
        ),
        compiler_params=pltpu.CompilerParams(
            dimension_semantics=("parallel",),
            vmem_limit_bytes=_VMEM_LIMIT,
        ),
    )(qkv)


# ----------------------------------------------------------------------------
# Mask glue (matches apply_masks / repeat_interleave_batch from the repo)
# ----------------------------------------------------------------------------
def apply_masks(x, masks):
    all_x = []
    for m in masks:
        idx = jnp.broadcast_to(m[:, :, None], (m.shape[0], m.shape[1], x.shape[-1]))
        all_x.append(jnp.take_along_axis(x, idx, axis=1))
    return jnp.concatenate(all_x, axis=0)


def repeat_interleave_batch(x, B, repeat):
    N = x.shape[0] // B
    return jnp.concatenate(
        [
            jnp.concatenate([x[i * B:(i + 1) * B] for _ in range(repeat)], axis=0)
            for i in range(N)
        ],
        axis=0,
    )


# ----------------------------------------------------------------------------
# Forward pass (shared between Pallas and pure-JAX reference ops)
# ----------------------------------------------------------------------------
def _forward_impl(params, cfg, ctxt, tgt, masks_ctxt, masks_tgt, actions,
                  mask_index, ops):
    # TODO(synk): only the mask-token branch is implemented; the diffusion
    # branch (mask_tokens is None) uses torch.randint/torch.randn and has no
    # deterministic Pallas equivalent here. `tgt`/`actions` are unused in the
    # mask-token branch, matching the PyTorch forward.
    del tgt, actions
    linear_fn, attention_fn = ops

    if not isinstance(masks_ctxt, (list, tuple)):
        masks_ctxt = [masks_ctxt]
    if not isinstance(masks_tgt, (list, tuple)):
        masks_tgt = [masks_tgt]

    B = ctxt.shape[0] // len(masks_ctxt)

    # map context tokens to predictor dimension
    x = linear_fn(ctxt, params["embed_w"], params["embed_b"])
    N_ctxt = x.shape[1]

    # add positional embedding to context tokens
    ctxt_pos = jnp.tile(params["pos_embed"], (B, 1, 1))
    x = x + apply_masks(ctxt_pos, masks_ctxt)

    # mask tokens for the targets (+ their positional embeddings)
    mi = mask_index % cfg["num_mask_tokens"]
    pred_tokens = jnp.tile(params["mask_tokens"][mi], (B, cfg["num_patches"], 1))
    pred_tokens = apply_masks(pred_tokens, masks_tgt)

    pos_embs = jnp.tile(params["pos_embed"], (B, 1, 1))
    pos_embs = apply_masks(pos_embs, masks_tgt)
    pos_embs = repeat_interleave_batch(pos_embs, B, repeat=len(masks_ctxt))
    pred_tokens = pred_tokens + pos_embs

    x = jnp.tile(x, (len(masks_tgt), 1, 1))
    x = jnp.concatenate([x, pred_tokens], axis=1)

    H = cfg["num_heads"]
    D = cfg["predictor_embed_dim"]
    scale = (D // H) ** -0.5

    for p in params["blocks"]:
        # --- attention sub-block (norm1 fused into qkv, residual into proj) ---
        qkv = linear_fn(x, p["qkv_w"], p["qkv_b"], ln=(p["norm1_g"], p["norm1_b"]))
        o = attention_fn(qkv, H, scale)
        x = linear_fn(o, p["proj_w"], p["proj_b"], residual=x)

        # --- MLP sub-block (norm2 fused into fc1, residual into fc2) ---
        h = linear_fn(x, p["fc1_w"], p["fc1_b"], activation="gelu",
                      ln=(p["norm2_g"], p["norm2_b"]))
        x = linear_fn(h, p["fc2_w"], p["fc2_b"], residual=x)

    # LayerNorm is row-wise, so slicing the target tokens first and fusing the
    # final norm into the projection is equivalent to norm-then-slice.
    x = x[:, N_ctxt:]
    x = linear_fn(x, params["proj_w"], params["proj_b"],
                  ln=(params["norm_g"], params["norm_b"]))
    return x.astype(jnp.float32)


def predictor_forward(params, cfg, ctxt, tgt, masks_ctxt, masks_tgt,
                      actions=None, mask_index=1):
    return _forward_impl(params, cfg, ctxt, tgt, masks_ctxt, masks_tgt, actions,
                         mask_index, ops=(pallas_linear, pallas_attention))


# ----------------------------------------------------------------------------
# Pure-JAX reference (same math / same bf16 operand flow, no Pallas)
# ----------------------------------------------------------------------------
def _ref_linear(x, w, b, activation=None, residual=None, ln=None):
    orig_shape = x.shape
    K = orig_shape[-1]
    E = w.shape[1]
    x2 = x.reshape(-1, K).astype(jnp.bfloat16)
    if ln is not None:
        g, bt = ln
        xf = x2.astype(jnp.float32)
        mean = jnp.mean(xf, axis=-1, keepdims=True)
        xc = xf - mean
        var = jnp.mean(xc * xc, axis=-1, keepdims=True)
        xn = xc * jax.lax.rsqrt(var + _LN_EPS) * g + bt
        x2 = xn.astype(jnp.bfloat16)
    y = jnp.dot(x2, w.astype(jnp.bfloat16), preferred_element_type=jnp.float32)
    y = y + b.astype(jnp.float32)
    if activation == "gelu":
        y = _gelu(y)
    if residual is not None:
        y = y + residual.reshape(-1, E).astype(jnp.bfloat16).astype(jnp.float32)
    return y.astype(jnp.bfloat16).reshape(*orig_shape[:-1], E)


def _ref_attention(qkv, num_heads, scale):
    Bx, N, C3 = qkv.shape
    C = C3 // 3
    hd = C // num_heads
    qkv = qkv.astype(jnp.bfloat16).reshape(Bx, N, 3, num_heads, hd)
    qkv = qkv.transpose(2, 0, 3, 1, 4)
    q, k, v = qkv[0], qkv[1], qkv[2]
    s = jnp.einsum("bhnd,bhmd->bhnm", q, k,
                   preferred_element_type=jnp.float32) * scale
    p = jax.nn.softmax(s, axis=-1)
    o = jnp.einsum("bhnm,bhmd->bhnd", p.astype(jnp.bfloat16), v,
                   preferred_element_type=jnp.float32)
    o = o.transpose(0, 2, 1, 3).reshape(Bx, N, C)
    return o.astype(jnp.bfloat16)


def reference_forward(params, cfg, ctxt, tgt, masks_ctxt, masks_tgt,
                      actions=None, mask_index=1):
    return _forward_impl(params, cfg, ctxt, tgt, masks_ctxt, masks_tgt, actions,
                         mask_index, ops=(_ref_linear, _ref_attention))


# ----------------------------------------------------------------------------
# Parameter init (mirrors the PyTorch module's init + _rescale_blocks)
# ----------------------------------------------------------------------------
def init_params(key, cfg):
    E = cfg["embed_dim"]
    D = cfg["predictor_embed_dim"]
    depth = cfg["depth"]
    hidden = int(D * cfg["mlp_ratio"])
    std = cfg["init_std"]

    keys = iter(jax.random.split(key, 4 + 4 * depth))

    def lin_w(k, fan_in, fan_out):
        return jax.random.normal(k, (fan_in, fan_out), jnp.float32) * std

    params = {
        "embed_w": lin_w(next(keys), E, D),
        "embed_b": jnp.zeros((D,), jnp.float32),
        # TODO(synk): sincos (get_3d_sincos_pos_embed) init replaced with a
        # deterministic random init; init-only, forward semantics unchanged.
        "pos_embed": jax.random.normal(next(keys), (1, cfg["num_patches"], D),
                                       jnp.float32) * 0.02,
        # zero_init_mask_tokens=True -> zeros
        "mask_tokens": [jnp.zeros((1, 1, D), jnp.float32)
                        for _ in range(cfg["num_mask_tokens"])],
        "blocks": [],
        "norm_g": jnp.ones((D,), jnp.float32),
        "norm_b": jnp.zeros((D,), jnp.float32),
        "proj_w": lin_w(next(keys), D, E),
        "proj_b": jnp.zeros((E,), jnp.float32),
    }

    for i in range(depth):
        rescale = 1.0 / math.sqrt(2.0 * (i + 1))   # _rescale_blocks
        blk = {
            "norm1_g": jnp.ones((D,), jnp.float32),
            "norm1_b": jnp.zeros((D,), jnp.float32),
            "qkv_w": lin_w(next(keys), D, 3 * D),
            "qkv_b": jnp.zeros((3 * D,), jnp.float32),   # qkv_bias=True, init 0
            "proj_w": lin_w(next(keys), D, D) * rescale,
            "proj_b": jnp.zeros((D,), jnp.float32),
            "norm2_g": jnp.ones((D,), jnp.float32),
            "norm2_b": jnp.zeros((D,), jnp.float32),
            "fc1_w": lin_w(next(keys), D, hidden),
            "fc1_b": jnp.zeros((hidden,), jnp.float32),
            "fc2_w": lin_w(next(keys), hidden, D) * rescale,
            "fc2_b": jnp.zeros((D,), jnp.float32),
        }
        params["blocks"].append(blk)
    return params


# ----------------------------------------------------------------------------
# Demo
# ----------------------------------------------------------------------------
if __name__ == "__main__":
    cfg = dict(
        img_size=16, patch_size=4, num_frames=2, tubelet_size=2,
        embed_dim=64, predictor_embed_dim=32, depth=2, num_heads=4,
        mlp_ratio=4.0, qkv_bias=True, init_std=0.02,
        use_mask_tokens=True, num_mask_tokens=2,
    )
    grid = cfg["img_size"] // cfg["patch_size"]          # 4
    cfg["num_patches"] = (cfg["num_frames"] // cfg["tubelet_size"]) * grid * grid  # 16

    key = jax.random.PRNGKey(0)
    kp, kc, kt = jax.random.split(key, 3)
    params = init_params(kp, cfg)

    B = 2
    N_ctxt, N_tgt = 8, 8
    masks_ctxt = [jnp.array([[0, 1, 2, 3, 4, 5, 6, 7],
                             [0, 2, 4, 6, 8, 10, 12, 14]], dtype=jnp.int32)]
    masks_tgt = [jnp.array([[8, 9, 10, 11, 12, 13, 14, 15],
                            [1, 3, 5, 7, 9, 11, 13, 15]], dtype=jnp.int32)]
    ctxt = jax.random.normal(kc, (B * len(masks_ctxt), N_ctxt, cfg["embed_dim"]),
                             jnp.float32)
    tgt = jax.random.normal(kt, (B * len(masks_tgt), N_tgt, cfg["embed_dim"]),
                            jnp.float32)
    actions = None  # unused by the forward (matches the PyTorch module)

    out = predictor_forward(params, cfg, ctxt, tgt, masks_ctxt, masks_tgt, actions)
    out = jax.block_until_ready(out)

    ref = reference_forward(params, cfg, ctxt, tgt, masks_ctxt, masks_tgt, actions)
    ref = jax.block_until_ready(ref)

    assert out.shape == (B * len(masks_tgt), N_tgt, cfg["embed_dim"]), out.shape
    max_diff = float(jnp.max(jnp.abs(out - ref)))
    # bf16 matmul operands + approximate EUP reciprocal in the softmax epilogue
    # -> compare against a reference with the same bf16 operand flow.
    assert jnp.allclose(out, ref, atol=1e-2, rtol=1e-2), f"max diff {max_diff}"

    print("KERNEL_OK")
</pallas_src>

<mosaic_0001>
module attributes {stable_mosaic.version = 11 : i64} {
  func.func @kernel(%arg0: i32, %arg1: i32, %arg2: memref<16x64xbf16, #tpu.memory_space<vmem>>, %arg3: memref<64x32xbf16, #tpu.memory_space<vmem>>, %arg4: memref<1x32xf32, #tpu.memory_space<vmem>>, %arg5: memref<16x32xbf16, #tpu.memory_space<vmem>>) attributes {dimension_semantics = [#tpu.dimension_semantics<parallel>, #tpu.dimension_semantics<parallel>], iteration_bounds = array<i64: 1, 1>, scalar_prefetch = 0 : i64, scratch_operands = 0 : i64, tpu.core_type = #tpu.core_type<tc>, window_params = [{transform_indices = @transform_0, window_bounds = array<i64: 16, 64>}, {pipeline_mode = #tpu.pipeline_mode<synchronous>, transform_indices = @transform_1, window_bounds = array<i64: 64, 32>}, {pipeline_mode = #tpu.pipeline_mode<synchronous>, transform_indices = @transform_2, window_bounds = array<i64: 1, 32>}, {transform_indices = @transform_3, window_bounds = array<i64: 16, 32>}]} {
    %c0 = arith.constant 0 : index
    %c0_0 = arith.constant 0 : index
    %0 = vector.load %arg2[%c0, %c0_0] : memref<16x64xbf16, #tpu.memory_space<vmem>>, vector<16x64xbf16>
    %c0_1 = arith.constant 0 : index
    %c0_2 = arith.constant 0 : index
    %1 = vector.load %arg3[%c0_1, %c0_2] : memref<64x32xbf16, #tpu.memory_space<vmem>>, vector<64x32xbf16>
    %cst = arith.constant dense<0.000000e+00> : vector<16x32xf32>
    %2 = tpu.matmul %0, %1, %cst {dimension_numbers = #tpu.dot_dimension_numbers<[1], [0], [0], [1], [0, 0, 1, 1], [], []>} : vector<16x64xbf16>, vector<64x32xbf16>, vector<16x32xf32> -> vector<16x32xf32>
    %c0_3 = arith.constant 0 : index
    %c0_4 = arith.constant 0 : index
    %3 = vector.load %arg4[%c0_3, %c0_4] : memref<1x32xf32, #tpu.memory_space<vmem>>, vector<1x32xf32>
    %4 = vector.broadcast %3 : vector<1x32xf32> to vector<16x32xf32>
    %5 = arith.addf %2, %4 : vector<16x32xf32>
    %6 = arith.truncf %5 : vector<16x32xf32> to vector<16x32xbf16>
    %c0_5 = arith.constant 0 : index
    %c0_6 = arith.constant 0 : index
    %7 = vector.load %arg5[%c0_5, %c0_6] : memref<16x32xbf16, #tpu.memory_space<vmem>>, vector<16x32xbf16>
    tpu.vector_store %arg5[%c0_5, %c0_6], %6 {strides = array<i32>} : memref<16x32xbf16, #tpu.memory_space<vmem>>, vector<16x32xbf16>,
    return
  }
  func.func @transform_0(%arg0: i32, %arg1: i32) -> (i32, i32) {
    %c0_i32 = arith.constant 0 : i32
    %c0_i32_0 = arith.constant 0 : i32
    return %arg0, %c0_i32 : i32, i32
  }
  func.func @transform_1(%arg0: i32, %arg1: i32) -> (i32, i32) {
    %c0_i32 = arith.constant 0 : i32
    %c0_i32_0 = arith.constant 0 : i32
    return %c0_i32, %arg1 : i32, i32
  }
  func.func @transform_2(%arg0: i32, %arg1: i32) -> (i32, i32) {
    %c0_i32 = arith.constant 0 : i32
    %c0_i32_0 = arith.constant 0 : i32
    return %c0_i32, %arg1 : i32, i32
  }
  func.func @transform_3(%arg0: i32, %arg1: i32) -> (i32, i32) {
    %c0_i32 = arith.constant 0 : i32
    return %arg0, %arg1 : i32, i32
  }
}

</mosaic_0001>

<bundles_post_ra>
// kernel: tpu_custom_call.1
= control target key start
LH: loop header
LB: loop body
LE: loop exit
PB: predicated region body
PF: predicated region fallthrough
CT: control target
= control target key end

     0   :  { %v196_v1 = vmov 0.0   ;;  %vm197_vm0 = vmmov 0   ;;  %s251_s0 = inlined_call_operand.vmem [shape: bf16[16,64], index: 0, kind: input, shape index: {}]   ;;  %s252_s1 = inlined_call_operand.vmem [shape: bf16[64,32], index: 1, kind: input, shape index: {}]   ;;  %s253_s2 = inlined_call_operand.vmem [shape: f32[1,32], index: 2, kind: input, shape index: {}]   ;;  %s254_s3 = inlined_call_operand.hbm [shape: bf16[16,32], index: 3, kind: output, shape index: {}]  }
   0x1   :  { %v167_v0 = vld [vmem:[%s252_s1] sm:$0xff]   ;;  %150 = vmatprep.subr.bf16.mxu0 %v196_v1  ;;  %v168_v2 = vld [vmem:[%s252_s1 + $0x8] sm:$0xff]   ;;  %158 = vmatprep.mubr.msk.bf16.mxu0 %vm197_vm0, %v196_v1 }
   0x2   :  { %151 = vmatpush3.bf16.msra.mxu0 %v167_v0 }
   0x3   :  { %152 = vmatprep.subr.bf16.mxu0 %v196_v1 }
   0x4   :  { %8 = vsyncpa [#allocation3], 0  ;;  %v169_v3 = vld [vmem:[%s252_s1 + $0x10] sm:$0xff]   ;;  %v170_v4 = vld [vmem:[%s252_s1 + $0x18] sm:$0xff]   ;;  %vm62_vm1 = vcmask 523264   ;;  %s198_s24 = smov [#allocation2]  }
   0x5   :  { %v171_v5 = vld [vmem:[%s251_s0] sm:$0xff]   ;;  %s123_s25 = sshll.u32 %s198_s24, 4  ;;  %vm115_vm2 = vcmask 257024   ;;  %s124_s25 = int_to_ptr.vmem [resolvable:$true] %s123_s25 }
   0x6   :  { %153 = vmatpush3.bf16.msra.mxu0 %v168_v2  ;;  %v134_v6 = vld [vmem:[%s253_s2] ss:$0 sm:$0xff]  ;;  %s172_s0 = scalar_lea.vmem %s124_s25, 128  ;;  %p177_p1 = scmp.lt.s32.totalorder %s124_s25, %s124_s25 }
   0x7   :  { %154 = vmatprep.subr.bf16.mxu0 %v196_v1  ;;  %p173_p0 = scmp.ne.s32.totalorder %s124_s25, %s172_s0  ;;  %p178_p2 = scmp.lt.s32.totalorder %s172_s0, %s172_s0 }
   0x9   :  { %p179_p3 = por %p178_p2, %p177_p1 }
   0xa   :  { %155 = vmatpush3.bf16.msra.mxu0 %v169_v3 }
   0xb   :  { %156 = vmatprep.subr.bf16.mxu0 %v196_v1  ;;  %p180_p4 = pnand %p179_p3, %p173_p0 }
   0xe   :  { %157 = vmatpush3.bf16.msra.mxu0 %v170_v4 }
  0x11   :  { %159 = vmatmul.mubr.msk.bf16.vlgmr.msra.gmra.mrb[0].mxu0 %vm62_vm1, %v171_v5 }
  0xe4   :  { %v100_v7 = vpop.f32.mrb[0].mxu0 }
  0xe5   :  { %v101_v8 = vadd.f32 %v134_v6, %v100_v7  ;;  %v160_v9 = vpop.f32.mrb[1].mxu0 }
  0xe6   :  { %v103_v10 = vpop.f32.mrb[2].mxu0 }
  0xe7   :  { %v143_v11 = vpack.c.bf16 %v101_v8, %v101_v8  ;;  %v104_v12 = vadd.f32 %v134_v6, %v103_v10  ;;  %v161_v13 = vpop.f32.mrb[3].mxu0 }
  0xe9   :  { %116 = vst.msk [vmem:[#allocation2] sm:$0xf] %vm115_vm2, %v143_v11  ;;  %v144_v14 = vpack.c.bf16 %v104_v12, %v104_v12 }
  0xeb   :  { %117 = vst.msk [vmem:[#allocation2 + $0x4] sm:$0xf] %vm115_vm2, %v144_v14 }
  0xec   :  { %183 = shalt.err (!%p180_p4)
}
  0xed   :  { %s184_s26 = scalar_lea.hbm %s254_s3, 128 }
  0xee   :  { %p185_p5 = scmp.ne.s32.totalorder %s254_s3, %s184_s26  ;;  %p188_p6 = scmp.lt.u32.totalorder %s184_s26, %s254_s3 }
  0xf0   :  { %p190_p7 = pnand %p188_p6, %p185_p5 }
  0xf2   :  { %193 = shalt.err (!%p190_p7)
}
  0xf3   :  { %s199_s4 = smov 64   ;;  %s200_s5 = smov 4  }
  0xf4   :  { %129 = dma.vmem_to_hbm [thread:$0]  %s124_s25, 128, %s254_s3, [#allocation3], %s199_s4, %s199_s4, %s200_s5  }
  0xf5   :  { %194 = dma.done.wait [#allocation3], 128  }
  0xf6   :  { %195 = vsyncadd [#allocation3], 4294967168 }
  0xf7   :  { %133 = vsyncpa [#allocation3], 1 }

</bundles_post_ra>
